<compile_context>
chip_gen: v6e
topology: v6e:2x2x1
jax: 0.10.0
libtpu: 0.0.40
codegen_flags: <defaults>
</compile_context>

<pallas_src>
import functools

import jax
import jax.numpy as jnp
from jax.experimental import pallas as pl
from jax.experimental.pallas import tpu as pltpu

_LANE = 128
_VMEM_WORKING_SET_BUDGET = 32 * 1024 * 1024   # bytes; conservative for v7x (64 MiB physical)
_VMEM_LIMIT_BYTES = 48 * 1024 * 1024          # explicit scoped-VMEM limit (v5e default is 16 MiB)


def _round_up(x, m):
    return ((x + m - 1) // m) * m


def _largest_divisor_tile(dim_pad, align, cap):
    """Largest multiple of `align` that divides dim_pad and is <= cap (>= align)."""
    cap = max(align, min(cap, dim_pad))
    best = align
    for t in range(align, cap + 1, align):
        if dim_pad % t == 0:
            best = t
    return best


def _choose_tiles(B_pad, C_pad, E_pad, itemsize, sublane, max_tk=None):
    """Pick (tm, tn, tk).  tk == E_pad means the no-K-tiling fast path."""
    tm_cap, tn_cap = 256, 1024
    if C_pad >= 2 * _LANE:
        # Keep >= 2 N tiles so v7x megacore can split the weight stream across its 2 TCs.
        tn_cap = min(tn_cap, C_pad // 2)

    tm = _largest_divisor_tile(B_pad, sublane, tm_cap)
    tn = _largest_divisor_tile(C_pad, _LANE, tn_cap)

    force_k = max_tk is not None and max_tk < E_pad

    def nok_fits(tm_, tn_):
        used = (2 * tm_ * E_pad      # activations (double-buffered)
                + 2 * E_pad * tn_    # weight
                + 2 * tn_            # bias
                + 2 * tm_ * tn_)     # output
        return used * itemsize <= _VMEM_WORKING_SET_BUDGET

    if not force_k:
        tm_n, tn_n = tm, tn
        while not nok_fits(tm_n, tn_n) and tn_n > _LANE:
            tn_n = _largest_divisor_tile(C_pad, _LANE, tn_n - _LANE)
        while not nok_fits(tm_n, tn_n) and tm_n > sublane:
            tm_n = _largest_divisor_tile(B_pad, sublane, tm_n - sublane)
        if nok_fits(tm_n, tn_n):
            return tm_n, tn_n, E_pad

    # K-tiled accumulator path (only for very large E, or forced for testing).
    tk_cap = 2048 if max_tk is None else max_tk
    tk = _largest_divisor_tile(E_pad, _LANE, tk_cap)

    def kt_fits(tm_, tn_, tk_):
        used = (2 * tm_ * tk_ + 2 * tk_ * tn_ + 2 * tn_ + 2 * tm_ * tn_) * itemsize \
               + tm_ * tn_ * 4  # f32 accumulator scratch
        return used <= _VMEM_WORKING_SET_BUDGET

    while not kt_fits(tm, tn, tk) and tk > _LANE:
        tk = _largest_divisor_tile(E_pad, _LANE, tk - _LANE)
    while not kt_fits(tm, tn, tk) and tn > _LANE:
        tn = _largest_divisor_tile(C_pad, _LANE, tn - _LANE)
    while not kt_fits(tm, tn, tk) and tm > sublane:
        tm = _largest_divisor_tile(B_pad, sublane, tm - sublane)
    return tm, tn, tk


# ---------------------------------------------------------------- kernels

def _linear_bias_kernel(x_ref, w_ref, b_ref, o_ref):
    # Fast path (no K tiling): x (tm, E), w (E, tn), b (1, tn), o (tm, tn).
    acc = jnp.dot(x_ref[...], w_ref[...], preferred_element_type=jnp.float32)
    o_ref[...] = (acc + b_ref[...].astype(jnp.float32)).astype(o_ref.dtype)


def _linear_bias_acc_kernel(x_ref, w_ref, b_ref, o_ref, acc_ref):
    # K-tiled path: x (tm, tk), w (tk, tn), b (1, tn), o (tm, tn), acc (tm, tn) f32.
    k = pl.program_id(2)

    @pl.when(k == 0)
    def _():
        acc_ref[...] = jnp.zeros_like(acc_ref)

    acc_ref[...] += jnp.dot(x_ref[...], w_ref[...], preferred_element_type=jnp.float32)

    @pl.when(k == pl.num_programs(2) - 1)
    def _():
        o_ref[...] = (acc_ref[...] + b_ref[...].astype(jnp.float32)).astype(o_ref.dtype)


def _pallas_linear_nok(x, w_t, b2d, tm, tn):
    B_pad, E_pad = x.shape
    C_pad = w_t.shape[1]
    grid = (B_pad // tm, C_pad // tn)  # N innermost -> x block reused across N tiles
    return pl.pallas_call(
        _linear_bias_kernel,
        out_shape=jax.ShapeDtypeStruct((B_pad, C_pad), x.dtype),
        grid=grid,
        in_specs=[
            pl.BlockSpec((tm, E_pad), lambda i, j: (i, 0)),   # activations
            pl.BlockSpec((E_pad, tn), lambda i, j: (0, j)),   # weight (E, C) layout
            pl.BlockSpec((1, tn), lambda i, j: (0, j)),       # bias slab per N tile
        ],
        out_specs=pl.BlockSpec((tm, tn), lambda i, j: (i, j)),
        compiler_params=pltpu.CompilerParams(
            dimension_semantics=("parallel", "parallel"),
            vmem_limit_bytes=_VMEM_LIMIT_BYTES,
        ),
    )(x, w_t, b2d)


def _pallas_linear_ktiled(x, w_t, b2d, tm, tn, tk):
    B_pad, E_pad = x.shape
    C_pad = w_t.shape[1]
    grid = (B_pad // tm, C_pad // tn, E_pad // tk)
    return pl.pallas_call(
        _linear_bias_acc_kernel,
        out_shape=jax.ShapeDtypeStruct((B_pad, C_pad), x.dtype),
        grid=grid,
        in_specs=[
            pl.BlockSpec((tm, tk), lambda i, j, k: (i, k)),
            pl.BlockSpec((tk, tn), lambda i, j, k: (k, j)),
            pl.BlockSpec((1, tn), lambda i, j, k: (0, j)),
        ],
        out_specs=pl.BlockSpec((tm, tn), lambda i, j, k: (i, j)),
        scratch_shapes=[pltpu.VMEM((tm, tn), jnp.float32)],
        compiler_params=pltpu.CompilerParams(
            dimension_semantics=("parallel", "parallel", "arbitrary"),
            vmem_limit_bytes=_VMEM_LIMIT_BYTES,
        ),
    )(x, w_t, b2d)


# ---------------------------------------------------------------- public API

def prepare_classification_head_params(weight, bias, param_dtype=None):
    """ONE-TIME parameter prep (call outside the hot loop).

    weight: (class_size, embed_size)  -- PyTorch nn.Linear layout.
    bias:   (class_size,)
    Returns (w_t, b2d): weight padded + transposed to (E_pad, C_pad), bias as (1, C_pad).
    Pass param_dtype=jnp.bfloat16 to halve the weight HBM stream (f32 accumulation kept).
    """
    C, E = weight.shape
    C_pad = _round_up(C, _LANE)
    E_pad = _round_up(E, _LANE)
    if param_dtype is not None:
        weight = weight.astype(param_dtype)
    w_t = jnp.pad(weight, ((0, C_pad - C), (0, E_pad - E))).T        # (E_pad, C_pad)
    b2d = jnp.pad(bias.reshape(1, C), ((0, 0), (0, C_pad - C)))      # (1, C_pad)
    return jnp.asarray(w_t), jnp.asarray(b2d)


@functools.partial(jax.jit, static_argnames=("class_size", "max_tk"))
def classification_head_prepared(hidden_state, w_t, b2d, *, class_size, max_tk=None):
    """logits = hidden_state @ weight.T + bias, with params from prepare_*_params.

    hidden_state: (B, E)      w_t: (E_pad, C_pad)      b2d: (1, C_pad)
    returns:      (B, class_size)
    """
    B, E = hidden_state.shape
    E_pad, C_pad = w_t.shape
    if E > E_pad or class_size > C_pad:
        raise ValueError("prepared params do not match hidden_state / class_size")

    itemsize = max(jnp.dtype(hidden_state.dtype).itemsize, jnp.dtype(w_t.dtype).itemsize)
    sublane = max(8, 32 // jnp.dtype(hidden_state.dtype).itemsize)   # 8 f32, 16 bf16
    B_pad = _round_up(B, sublane)

    x = hidden_state
    if (B_pad, E_pad) != (B, E):
        # Only the small activation stream is padded per call; the big weight was
        # padded once at prepare time.
        x = jnp.pad(x, ((0, B_pad - B), (0, E_pad - E)))

    tm, tn, tk = _choose_tiles(B_pad, C_pad, E_pad, itemsize, sublane, max_tk)

    if tk == E_pad:
        out = _pallas_linear_nok(x, w_t, b2d, tm, tn)
    else:
        out = _pallas_linear_ktiled(x, w_t, b2d, tm, tn, tk)

    if (B_pad, C_pad) != (B, class_size):
        out = out[:B, :class_size]
    return out


def classification_head(hidden_state, weight, bias):
    """One-shot convenience wrapper (prepares params on every call).

    For repeated use, call prepare_classification_head_params ONCE and reuse
    classification_head_prepared so the weight pad/transpose stays off the hot path.
    """
    w_t, b2d = prepare_classification_head_params(weight, bias)
    return classification_head_prepared(hidden_state, w_t, b2d,
                                        class_size=weight.shape[0])


# ---------------------------------------------------------------- demo / check

if __name__ == "__main__":
    key = jax.random.PRNGKey(0)
    kx1, kw1, kb1, kx2, kw2, kb2 = jax.random.split(key, 6)

    # --- config 1: typical tiny head (exercises the no-K fast path, single N tile) ---
    class_size, embed_size, batch = 8, 1024, 16
    bound = 1.0 / (embed_size ** 0.5)
    weight = jax.random.uniform(kw1, (class_size, embed_size),
                                minval=-bound, maxval=bound, dtype=jnp.float32)
    bias = jax.random.uniform(kb1, (class_size,),
                              minval=-bound, maxval=bound, dtype=jnp.float32)
    hidden_state = jax.random.normal(kx1, (batch, embed_size), dtype=jnp.float32)

    w_t, b2d = prepare_classification_head_params(weight, bias)   # once, off the hot path
    logits = classification_head_prepared(hidden_state, w_t, b2d, class_size=class_size)
    logits = jax.block_until_ready(logits)

    ref = hidden_state @ weight.T + bias
    assert logits.shape == (batch, class_size)
    assert jnp.allclose(logits, ref, atol=5e-4, rtol=5e-4), \
        float(jnp.max(jnp.abs(logits - ref)))

    # --- config 2: ragged batch + multi-N-tile C (padding/slicing + >=2 parallel N tiles),
    #     plus a forced K-tiled run to exercise the accumulator path. ---
    class_size2, embed_size2, batch2 = 384, 768, 20
    bound2 = 1.0 / (embed_size2 ** 0.5)
    weight2 = jax.random.uniform(kw2, (class_size2, embed_size2),
                                 minval=-bound2, maxval=bound2, dtype=jnp.float32)
    bias2 = jax.random.uniform(kb2, (class_size2,),
                               minval=-bound2, maxval=bound2, dtype=jnp.float32)
    hidden_state2 = jax.random.normal(kx2, (batch2, embed_size2), dtype=jnp.float32)

    w_t2, b2d2 = prepare_classification_head_params(weight2, bias2)
    ref2 = hidden_state2 @ weight2.T + bias2

    logits2 = classification_head_prepared(hidden_state2, w_t2, b2d2,
                                           class_size=class_size2)
    logits2 = jax.block_until_ready(logits2)
    assert logits2.shape == (batch2, class_size2)
    assert jnp.allclose(logits2, ref2, atol=5e-4, rtol=5e-4), \
        float(jnp.max(jnp.abs(logits2 - ref2)))

    logits3 = classification_head_prepared(hidden_state2, w_t2, b2d2,
                                           class_size=class_size2, max_tk=256)
    logits3 = jax.block_until_ready(logits3)
    assert jnp.allclose(logits3, ref2, atol=5e-4, rtol=5e-4), \
        float(jnp.max(jnp.abs(logits3 - ref2)))

    print("KERNEL_OK")
</pallas_src>

<mosaic_0001>
module attributes {stable_mosaic.version = 11 : i64} {
  func.func @_linear_bias_kernel(%arg0: i32, %arg1: i32, %arg2: memref<16x1024xf32, #tpu.memory_space<vmem>>, %arg3: memref<1024x128xf32, #tpu.memory_space<vmem>>, %arg4: memref<1x128xf32, #tpu.memory_space<vmem>>, %arg5: memref<16x128xf32, #tpu.memory_space<vmem>>) attributes {dimension_semantics = [#tpu.dimension_semantics<parallel>, #tpu.dimension_semantics<parallel>], iteration_bounds = array<i64: 1, 1>, scalar_prefetch = 0 : i64, scratch_operands = 0 : i64, tpu.core_type = #tpu.core_type<tc>, window_params = [{transform_indices = @transform_0, window_bounds = array<i64: 16, 1024>}, {transform_indices = @transform_1, window_bounds = array<i64: 1024, 128>}, {transform_indices = @transform_2, window_bounds = array<i64: 1, 128>}, {transform_indices = @transform_3, window_bounds = array<i64: 16, 128>}]} {
    %c0 = arith.constant 0 : index
    %c0_0 = arith.constant 0 : index
    %0 = vector.load %arg2[%c0, %c0_0] : memref<16x1024xf32, #tpu.memory_space<vmem>>, vector<16x1024xf32>
    %c0_1 = arith.constant 0 : index
    %c0_2 = arith.constant 0 : index
    %1 = vector.load %arg3[%c0_1, %c0_2] : memref<1024x128xf32, #tpu.memory_space<vmem>>, vector<1024x128xf32>
    %cst = arith.constant dense<0.000000e+00> : vector<16x128xf32>
    %2 = tpu.matmul %0, %1, %cst {dimension_numbers = #tpu.dot_dimension_numbers<[1], [0], [0], [1], [0, 0, 1, 1], [], []>} : vector<16x1024xf32>, vector<1024x128xf32>, vector<16x128xf32> -> vector<16x128xf32>
    %c0_3 = arith.constant 0 : index
    %c0_4 = arith.constant 0 : index
    %3 = vector.load %arg4[%c0_3, %c0_4] : memref<1x128xf32, #tpu.memory_space<vmem>>, vector<1x128xf32>
    %4 = vector.broadcast %3 : vector<1x128xf32> to vector<16x128xf32>
    %5 = arith.addf %2, %4 : vector<16x128xf32>
    %c0_5 = arith.constant 0 : index
    %c0_6 = arith.constant 0 : index
    %6 = vector.load %arg5[%c0_5, %c0_6] : memref<16x128xf32, #tpu.memory_space<vmem>>, vector<16x128xf32>
    tpu.vector_store %arg5[%c0_5, %c0_6], %5 {strides = array<i32>} : memref<16x128xf32, #tpu.memory_space<vmem>>, vector<16x128xf32>,
    return
  }
  func.func @transform_0(%arg0: i32, %arg1: i32) -> (i32, i32) {
    %c0_i32 = arith.constant 0 : i32
    %c0_i32_0 = arith.constant 0 : i32
    return %arg0, %c0_i32 : i32, i32
  }
  func.func @transform_1(%arg0: i32, %arg1: i32) -> (i32, i32) {
    %c0_i32 = arith.constant 0 : i32
    %c0_i32_0 = arith.constant 0 : i32
    return %c0_i32, %arg1 : i32, i32
  }
  func.func @transform_2(%arg0: i32, %arg1: i32) -> (i32, i32) {
    %c0_i32 = arith.constant 0 : i32
    %c0_i32_0 = arith.constant 0 : i32
    return %c0_i32, %arg1 : i32, i32
  }
  func.func @transform_3(%arg0: i32, %arg1: i32) -> (i32, i32) {
    %c0_i32 = arith.constant 0 : i32
    return %arg0, %arg1 : i32, i32
  }
}

</mosaic_0001>

<bundles_post_ra>
// kernel: classification_head_prepared.1
= control target key start
LH: loop header
LB: loop body
LE: loop exit
PB: predicated region body
PF: predicated region fallthrough
CT: control target
= control target key end

     0   :  { %8 = vsyncpa [#allocation3], 0  ;;  %s745_s0 = inlined_call_operand.hbm [shape: f32[16,1024], index: 0, kind: input, shape index: {}]   ;;  %s746_s1 = inlined_call_operand.hbm [shape: f32[1024,128], index: 1, kind: input, shape index: {}]   ;;  %s747_s2 = inlined_call_operand.vmem [shape: f32[1,128], index: 2, kind: input, shape index: {}]   ;;  %s748_s3 = inlined_call_operand.vmem [shape: f32[16,128], index: 3, kind: output, shape index: {}]  }
   0x1   :  { %9 = vsyncpa [#allocation5], 0  ;;  %s704_s12 = smov [#allocation2]  }
   0x2   :  { %s15_s13 = sshll.u32 %s704_s12, 4  ;;  %s16_s13 = int_to_ptr.vmem [resolvable:$true] %s15_s13 }
   0x3   :  { %s668_s14 = scalar_lea.vmem %s16_s13, 2048  ;;  %p673_p1 = scmp.lt.s32.totalorder %s16_s13, %s16_s13 }
   0x4   :  { %p669_p0 = scmp.ne.s32.totalorder %s16_s13, %s668_s14  ;;  %p674_p2 = scmp.lt.s32.totalorder %s668_s14, %s668_s14 }
   0x6   :  { %p675_p3 = por %p674_p2, %p673_p1 }
   0x8   :  { %p676_p4 = pnand %p675_p3, %p669_p0 }
   0xa   :  { %679 = shalt.err (!%p676_p4)
}
   0xb   :  { %s705_s15 = smov 1024   ;;  %s706_s16 = smov 64  }
   0xc   :  { %21 = dma.hbm_to_vmem [thread:$0]  %s745_s0, 2048, %s16_s13, [#allocation3], %s705_s15, %s705_s15, %s706_s16  }
   0xd   :  { %s707_s19 = smov [#allocation4]  }
   0xe   :  { %s27_s20 = sshll.u32 %s707_s19, 4  ;;  %s28_s20 = int_to_ptr.vmem [resolvable:$true] %s27_s20 }
   0xf   :  { %s688_s21 = scalar_lea.vmem %s28_s20, 16384  ;;  %p693_p6 = scmp.lt.s32.totalorder %s28_s20, %s28_s20 }
  0x10   :  { %p689_p5 = scmp.ne.s32.totalorder %s28_s20, %s688_s21  ;;  %p694_p7 = scmp.lt.s32.totalorder %s688_s21, %s688_s21 }
  0x12   :  { %p695_p8 = por %p694_p7, %p693_p6 }
  0x14   :  { %p696_p9 = pnand %p695_p8, %p689_p5 }
  0x16   :  { %699 = shalt.err (!%p696_p9)
}
  0x17   :  { %s708_s22 = smov 128   ;;  %s709_s23 = smov 8  }
  0x18   :  { %33 = dma.hbm_to_vmem [thread:$0]  %s746_s1, 16384, %s28_s20, [#allocation5], %s708_s22, %s708_s22, %s709_s23  }
  0x19   :  { %700 = dma.done.wait [#allocation3], 2048  }
  0x1a   :  { %701 = vsyncadd [#allocation3], 4294965248 }
  0x1b   :  { %702 = dma.done.wait [#allocation5], 16384  }
  0x1c   :  { %703 = vsyncadd [#allocation5], 4294950912  ;;  %v89_v0 = vld [vmem:[#allocation4 + $0xf8] sm:$0xff]  ;;  %v88_v4 = vld [vmem:[#allocation4 + $0xf0] sm:$0xff] }
  0x1d   :  { %v121_v1 = vld [vmem:[#allocation4 + $0x1f8] sm:$0xff]  ;;  %502 = vmatprep.subr.mxu0 %v89_v0  ;;  %v120_v5 = vld [vmem:[#allocation4 + $0x1f0] sm:$0xff]  ;;  %v87_v8 = vld [vmem:[#allocation4 + $0xe8] sm:$0xff] }
  0x1e   :  { %v73_v2 = vld [vmem:[#allocation4 + $0x78] sm:$0xff]  ;;  %540 = vmatprep.subr.mxu1 %v121_v1  ;;  %v72_v6 = vld [vmem:[#allocation4 + $0x70] sm:$0xff]  ;;  %v119_v9 = vld [vmem:[#allocation4 + $0x1e8] sm:$0xff] }
  0x1f   :  { %v105_v3 = vld [vmem:[#allocation4 + $0x178] sm:$0xff]  ;;  %503 = vmatpush3.msra.mxu0 %v73_v2  ;;  %v104_v7 = vld [vmem:[#allocation4 + $0x170] sm:$0xff]  ;;  %v71_v10 = vld [vmem:[#allocation4 + $0x68] sm:$0xff] }
  0x20   :  { %541 = vmatpush3.msra.mxu1 %v105_v3  ;;  %504 = vmatprep.subr.mxu0 %v88_v4  ;;  %v103_v11 = vld [vmem:[#allocation4 + $0x168] sm:$0xff]  ;;  %v86_v12 = vld [vmem:[#allocation4 + $0xe0] sm:$0xff]  ;;  %v85_v16 = vld [vmem:[#allocation4 + $0xd8] sm:$0xff] }
  0x21   :  { %542 = vmatprep.subr.mxu1 %v120_v5  ;;  %505 = vmatpush3.msra.mxu0 %v72_v6  ;;  %v118_v13 = vld [vmem:[#allocation4 + $0x1e0] sm:$0xff]  ;;  %v117_v17 = vld [vmem:[#allocation4 + $0x1d8] sm:$0xff]  ;;  %v84_v20 = vld [vmem:[#allocation4 + $0xd0] sm:$0xff] }
  0x22   :  { %543 = vmatpush3.msra.mxu1 %v104_v7  ;;  %506 = vmatprep.subr.mxu0 %v87_v8  ;;  %v70_v14 = vld [vmem:[#allocation4 + $0x60] sm:$0xff]  ;;  %v69_v18 = vld [vmem:[#allocation4 + $0x58] sm:$0xff]  ;;  %v116_v21 = vld [vmem:[#allocation4 + $0x1d0] sm:$0xff] }
  0x23   :  { %544 = vmatprep.subr.mxu1 %v119_v9  ;;  %v102_v15 = vld [vmem:[#allocation4 + $0x160] sm:$0xff]  ;;  %507 = vmatpush3.msra.mxu0 %v71_v10  ;;  %v101_v19 = vld [vmem:[#allocation4 + $0x158] sm:$0xff]  ;;  %v68_v22 = vld [vmem:[#allocation4 + $0x50] sm:$0xff] }
  0x24   :  { %545 = vmatpush3.msra.mxu1 %v103_v11  ;;  %508 = vmatprep.subr.mxu0 %v86_v12  ;;  %v100_v23 = vld [vmem:[#allocation4 + $0x150] sm:$0xff]  ;;  %v83_v24 = vld [vmem:[#allocation4 + $0xc8] sm:$0xff]  ;;  %v82_v28 = vld [vmem:[#allocation4 + $0xc0] sm:$0xff] }
  0x25   :  { %546 = vmatprep.subr.mxu1 %v118_v13  ;;  %509 = vmatpush3.msra.mxu0 %v70_v14  ;;  %v115_v25 = vld [vmem:[#allocation4 + $0x1c8] sm:$0xff]  ;;  %v114_v29 = vld [vmem:[#allocation4 + $0x1c0] sm:$0xff]  ;;  %v81_v32 = vld [vmem:[#allocation4 + $0xb8] sm:$0xff] }
  0x26   :  { %547 = vmatpush3.msra.mxu1 %v102_v15  ;;  %510 = vmatprep.subr.mxu0 %v85_v16  ;;  %v67_v26 = vld [vmem:[#allocation4 + $0x48] sm:$0xff]  ;;  %v66_v30 = vld [vmem:[#allocation4 + $0x40] sm:$0xff]  ;;  %v113_v33 = vld [vmem:[#allocation4 + $0x1b8] sm:$0xff] }
  0x27   :  { %548 = vmatprep.subr.mxu1 %v117_v17  ;;  %511 = vmatpush3.msra.mxu0 %v69_v18  ;;  %v99_v27 = vld [vmem:[#allocation4 + $0x148] sm:$0xff]  ;;  %v98_v31 = vld [vmem:[#allocation4 + $0x140] sm:$0xff]  ;;  %v65_v34 = vld [vmem:[#allocation4 + $0x38] sm:$0xff] }
  0x28   :  { %549 = vmatpush3.msra.mxu1 %v101_v19  ;;  %512 = vmatprep.subr.mxu0 %v84_v20  ;;  %v97_v35 = vld [vmem:[#allocation4 + $0x138] sm:$0xff]  ;;  %v80_v36 = vld [vmem:[#allocation4 + $0xb0] sm:$0xff]  ;;  %v79_v40 = vld [vmem:[#allocation4 + $0xa8] sm:$0xff] }
  0x29   :  { %550 = vmatprep.subr.mxu1 %v116_v21  ;;  %513 = vmatpush3.msra.mxu0 %v68_v22  ;;  %v112_v37 = vld [vmem:[#allocation4 + $0x1b0] sm:$0xff]  ;;  %v111_v41 = vld [vmem:[#allocation4 + $0x1a8] sm:$0xff]  ;;  %v78_v44 = vld [vmem:[#allocation4 + $0xa0] sm:$0xff] }
  0x2a   :  { %551 = vmatpush3.msra.mxu1 %v100_v23  ;;  %514 = vmatprep.subr.mxu0 %v83_v24  ;;  %v64_v38 = vld [vmem:[#allocation4 + $0x30] sm:$0xff]  ;;  %v63_v42 = vld [vmem:[#allocation4 + $0x28] sm:$0xff]  ;;  %v110_v45 = vld [vmem:[#allocation4 + $0x1a0] sm:$0xff] }
  0x2b   :  { %552 = vmatprep.subr.mxu1 %v115_v25  ;;  %515 = vmatpush3.msra.mxu0 %v67_v26  ;;  %v96_v39 = vld [vmem:[#allocation4 + $0x130] sm:$0xff]  ;;  %v95_v43 = vld [vmem:[#allocation4 + $0x128] sm:$0xff]  ;;  %v62_v46 = vld [vmem:[#allocation4 + $0x20] sm:$0xff] }
  0x2c   :  { %553 = vmatpush3.msra.mxu1 %v99_v27  ;;  %516 = vmatprep.subr.mxu0 %v82_v28  ;;  %v94_v47 = vld [vmem:[#allocation4 + $0x120] sm:$0xff]  ;;  %v77_v48 = vld [vmem:[#allocation4 + $0x98] sm:$0xff]  ;;  %v76_v52 = vld [vmem:[#allocation4 + $0x90] sm:$0xff] }
  0x2d   :  { %554 = vmatprep.subr.mxu1 %v114_v29  ;;  %517 = vmatpush3.msra.mxu0 %v66_v30  ;;  %v109_v49 = vld [vmem:[#allocation4 + $0x198] sm:$0xff]  ;;  %v108_v53 = vld [vmem:[#allocation4 + $0x190] sm:$0xff]  ;;  %v75_v56 = vld [vmem:[#allocation4 + $0x88] sm:$0xff] }
  0x2e   :  { %555 = vmatpush3.msra.mxu1 %v98_v31  ;;  %518 = vmatprep.subr.mxu0 %v81_v32  ;;  %v61_v50 = vld [vmem:[#allocation4 + $0x18] sm:$0xff]  ;;  %v60_v54 = vld [vmem:[#allocation4 + $0x10] sm:$0xff]  ;;  %v107_v57 = vld [vmem:[#allocation4 + $0x188] sm:$0xff] }
  0x2f   :  { %556 = vmatprep.subr.mxu1 %v113_v33  ;;  %519 = vmatpush3.msra.mxu0 %v65_v34  ;;  %v93_v51 = vld [vmem:[#allocation4 + $0x118] sm:$0xff]  ;;  %v92_v55 = vld [vmem:[#allocation4 + $0x110] sm:$0xff]  ;;  %v59_v58 = vld [vmem:[#allocation4 + $0x8] sm:$0xff] }
  0x30   :  { %557 = vmatpush3.msra.mxu1 %v97_v35  ;;  %520 = vmatprep.subr.mxu0 %v80_v36  ;;  %v91_v59 = vld [vmem:[#allocation4 + $0x108] sm:$0xff]  ;;  %v74_v60 = vld [vmem:[#allocation4 + $0x80] sm:$0xff]  ;;  %v45_v2 = vld [vmem:[#allocation2 + $0x18] sm:$0xff] }
  0x31   :  { %558 = vmatprep.subr.mxu1 %v112_v37  ;;  %521 = vmatpush3.msra.mxu0 %v64_v38  ;;  %v106_v61 = vld [vmem:[#allocation4 + $0x180] sm:$0xff]  ;;  %v43_v63 = vld [vmem:[#allocation2 + $0x8] sm:$0xff]  ;;  %v153_v3 = vld [vmem:[#allocation4 + $0x2f8] sm:$0xff] }
  0x32   :  { %559 = vmatpush3.msra.mxu1 %v96_v39  ;;  %522 = vmatprep.subr.mxu0 %v79_v40  ;;  %v58_v62 = vld [vmem:[#allocation4] sm:$0xff]  ;;  %v185_v4 = vld [vmem:[#allocation4 + $0x3f8] sm:$0xff]  ;;  %v44_v5 = vld [vmem:[#allocation2 + $0x10] sm:$0xff] }
  0x33   :  { %560 = vmatprep.subr.mxu1 %v111_v41  ;;  %523 = vmatpush3.msra.mxu0 %v63_v42  ;;  %v90_v0 = vld [vmem:[#allocation4 + $0x100] sm:$0xff]  ;;  %v137_v6 = vld [vmem:[#allocation4 + $0x278] sm:$0xff]  ;;  %v152_v8 = vld [vmem:[#allocation4 + $0x2f0] sm:$0xff] }
  0x34   :  { %561 = vmatpush3.msra.mxu1 %v95_v43  ;;  %524 = vmatprep.subr.mxu0 %v78_v44  ;;  %v42_v1 = vld [vmem:[#allocation2] sm:$0xff]  ;;  %v169_v7 = vld [vmem:[#allocation4 + $0x378] sm:$0xff]  ;;  %v184_v9 = vld [vmem:[#allocation4 + $0x3f0] sm:$0xff] }
  0x35   :  { %562 = vmatprep.subr.mxu1 %v110_v45  ;;  %525 = vmatpush3.msra.mxu0 %v62_v46  ;;  %v136_v10 = vld [vmem:[#allocation4 + $0x270] sm:$0xff]  ;;  %v151_v12 = vld [vmem:[#allocation4 + $0x2e8] sm:$0xff]  ;;  %v150_v16 = vld [vmem:[#allocation4 + $0x2e0] sm:$0xff] }
  0x36   :  { %563 = vmatpush3.msra.mxu1 %v94_v47  ;;  %526 = vmatprep.subr.mxu0 %v77_v48  ;;  %v168_v11 = vld [vmem:[#allocation4 + $0x370] sm:$0xff]  ;;  %v183_v13 = vld [vmem:[#allocation4 + $0x3e8] sm:$0xff]  ;;  %v182_v17 = vld [vmem:[#allocation4 + $0x3e0] sm:$0xff] }
  0x37   :  { %564 = vmatprep.subr.mxu1 %v109_v49  ;;  %527 = vmatpush3.msra.mxu0 %v61_v50  ;;  %v135_v14 = vld [vmem:[#allocation4 + $0x268] sm:$0xff]  ;;  %v134_v18 = vld [vmem:[#allocation4 + $0x260] sm:$0xff]  ;;  %v149_v20 = vld [vmem:[#allocation4 + $0x2d8] sm:$0xff] }
  0x38   :  { %565 = vmatpush3.msra.mxu1 %v93_v51  ;;  %528 = vmatprep.subr.mxu0 %v76_v52  ;;  %v167_v15 = vld [vmem:[#allocation4 + $0x368] sm:$0xff]  ;;  %v166_v19 = vld [vmem:[#allocation4 + $0x360] sm:$0xff]  ;;  %v181_v21 = vld [vmem:[#allocation4 + $0x3d8] sm:$0xff] }
  0x39   :  { %566 = vmatprep.subr.mxu1 %v108_v53  ;;  %529 = vmatpush3.msra.mxu0 %v60_v54  ;;  %v133_v22 = vld [vmem:[#allocation4 + $0x258] sm:$0xff]  ;;  %v148_v24 = vld [vmem:[#allocation4 + $0x2d0] sm:$0xff]  ;;  %v147_v28 = vld [vmem:[#allocation4 + $0x2c8] sm:$0xff] }
  0x3a   :  { %567 = vmatpush3.msra.mxu1 %v92_v55  ;;  %530 = vmatprep.subr.mxu0 %v75_v56  ;;  %v165_v23 = vld [vmem:[#allocation4 + $0x358] sm:$0xff]  ;;  %v180_v25 = vld [vmem:[#allocation4 + $0x3d0] sm:$0xff]  ;;  %v179_v29 = vld [vmem:[#allocation4 + $0x3c8] sm:$0xff] }
  0x3b   :  { %568 = vmatprep.subr.mxu1 %v107_v57  ;;  %531 = vmatpush3.msra.mxu0 %v59_v58  ;;  %v132_v26 = vld [vmem:[#allocation4 + $0x250] sm:$0xff]  ;;  %v131_v30 = vld [vmem:[#allocation4 + $0x248] sm:$0xff]  ;;  %v146_v32 = vld [vmem:[#allocation4 + $0x2c0] sm:$0xff] }
  0x3c   :  { %569 = vmatpush3.msra.mxu1 %v91_v59  ;;  %532 = vmatprep.subr.mxu0 %v74_v60  ;;  %v164_v27 = vld [vmem:[#allocation4 + $0x350] sm:$0xff]  ;;  %v163_v31 = vld [vmem:[#allocation4 + $0x348] sm:$0xff]  ;;  %v178_v33 = vld [vmem:[#allocation4 + $0x3c0] sm:$0xff] }
  0x3d   :  { %570 = vmatprep.subr.mxu1 %v106_v61  ;;  %533 = vmatpush3.msra.mxu0 %v58_v62  ;;  %v130_v34 = vld [vmem:[#allocation4 + $0x240] sm:$0xff]  ;;  %v145_v36 = vld [vmem:[#allocation4 + $0x2b8] sm:$0xff]  ;;  %v144_v40 = vld [vmem:[#allocation4 + $0x2b0] sm:$0xff] }
  0x3e   :  { %257 = vmatprep.mubr.f32.mxu0 %v43_v63  ;;  %571 = vmatpush3.msra.mxu1 %v90_v0  ;;  %v162_v35 = vld [vmem:[#allocation4 + $0x340] sm:$0xff]  ;;  %v177_v37 = vld [vmem:[#allocation4 + $0x3b8] sm:$0xff]  ;;  %v176_v41 = vld [vmem:[#allocation4 + $0x3b0] sm:$0xff] }
  0x3f   :  { %258 = vmatmul.mubr.f32.vlgmr.msra.gmra.mxu0 %v42_v1  ;;  %332 = vmatprep.mubr.f32.mxu1 %v45_v2  ;;  %v129_v38 = vld [vmem:[#allocation4 + $0x238] sm:$0xff]  ;;  %v128_v42 = vld [vmem:[#allocation4 + $0x230] sm:$0xff]  ;;  %v143_v44 = vld [vmem:[#allocation4 + $0x2a8] sm:$0xff] }
  0x40   :  { %578 = vmatprep.subr.mxu0 %v153_v3  ;;  %616 = vmatprep.subr.mxu1 %v185_v4  ;;  %v161_v39 = vld [vmem:[#allocation4 + $0x338] sm:$0xff]  ;;  %v160_v43 = vld [vmem:[#allocation4 + $0x330] sm:$0xff]  ;;  %v175_v45 = vld [vmem:[#allocation4 + $0x3a8] sm:$0xff] }
  0x41   :  { %333 = vmatmul.mubr.f32.vlgmr.msra.gmra.mxu1 %v44_v5  ;;  %579 = vmatpush3.msra.mxu0 %v137_v6  ;;  %v127_v46 = vld [vmem:[#allocation4 + $0x228] sm:$0xff]  ;;  %v142_v48 = vld [vmem:[#allocation4 + $0x2a0] sm:$0xff]  ;;  %v141_v52 = vld [vmem:[#allocation4 + $0x298] sm:$0xff] }
  0x42   :  { %617 = vmatpush3.msra.mxu1 %v169_v7  ;;  %580 = vmatprep.subr.mxu0 %v152_v8  ;;  %v159_v47 = vld [vmem:[#allocation4 + $0x328] sm:$0xff]  ;;  %v174_v49 = vld [vmem:[#allocation4 + $0x3a0] sm:$0xff]  ;;  %v173_v53 = vld [vmem:[#allocation4 + $0x398] sm:$0xff] }
  0x43   :  { %618 = vmatprep.subr.mxu1 %v184_v9  ;;  %581 = vmatpush3.msra.mxu0 %v136_v10  ;;  %v126_v50 = vld [vmem:[#allocation4 + $0x220] sm:$0xff]  ;;  %v51_v54 = vld [vmem:[#allocation2 + $0x48] sm:$0xff]  ;;  %v125_v55 = vld [vmem:[#allocation4 + $0x218] sm:$0xff] }
  0x44   :  { %619 = vmatpush3.msra.mxu1 %v168_v11  ;;  %582 = vmatprep.subr.mxu0 %v151_v12  ;;  %v158_v51 = vld [vmem:[#allocation4 + $0x320] sm:$0xff]  ;;  %v157_v56 = vld [vmem:[#allocation4 + $0x318] sm:$0xff]  ;;  %v140_v58 = vld [vmem:[#allocation4 + $0x290] sm:$0xff] }
  0x45   :  { %620 = vmatprep.subr.mxu1 %v183_v13  ;;  %583 = vmatpush3.msra.mxu0 %v135_v14  ;;  %v50_v57 = vld [vmem:[#allocation2 + $0x40] sm:$0xff]  ;;  %v172_v59 = vld [vmem:[#allocation4 + $0x390] sm:$0xff]  ;;  %v53_v60 = vld [vmem:[#allocation2 + $0x58] sm:$0xff] }
  0x46   :  { %621 = vmatpush3.msra.mxu1 %v167_v15  ;;  %584 = vmatprep.subr.mxu0 %v150_v16  ;;  %v124_v61 = vld [vmem:[#allocation4 + $0x210] sm:$0xff]  ;;  %v139_v63 = vld [vmem:[#allocation4 + $0x288] sm:$0xff]  ;;  %v138_v4 = vld [vmem:[#allocation4 + $0x280] sm:$0xff] }
  0x47   :  { %622 = vmatprep.subr.mxu1 %v182_v17  ;;  %585 = vmatpush3.msra.mxu0 %v134_v18  ;;  %v156_v62 = vld [vmem:[#allocation4 + $0x310] sm:$0xff]  ;;  %v171_v1 = vld [vmem:[#allocation4 + $0x388] sm:$0xff]  ;;  %v170_v5 = vld [vmem:[#allocation4 + $0x380] sm:$0xff] }
  0x48   :  { %623 = vmatpush3.msra.mxu1 %v166_v19  ;;  %586 = vmatprep.subr.mxu0 %v149_v20  ;;  %v52_v0 = vld [vmem:[#allocation2 + $0x50] sm:$0xff]  ;;  %v123_v2 = vld [vmem:[#allocation4 + $0x208] sm:$0xff]  ;;  %v122_v6 = vld [vmem:[#allocation4 + $0x200] sm:$0xff] }
  0x49   :  { %624 = vmatprep.subr.mxu1 %v181_v21  ;;  %587 = vmatpush3.msra.mxu0 %v133_v22  ;;  %v155_v3 = vld [vmem:[#allocation4 + $0x308] sm:$0xff]  ;;  %v154_v8 = vld [vmem:[#allocation4 + $0x300] sm:$0xff]  ;;  %v49_v9 = vld [vmem:[#allocation2 + $0x38] sm:$0xff] }
  0x4a   :  { %625 = vmatpush3.msra.mxu1 %v165_v23  ;;  %588 = vmatprep.subr.mxu0 %v148_v24  ;;  %v47_v7 = vld [vmem:[#allocation2 + $0x28] sm:$0xff]  ;;  %v46_v10 = vld [vmem:[#allocation2 + $0x20] sm:$0xff]  ;;  %v48_v11 = vld [vmem:[#allocation2 + $0x30] sm:$0xff] }
  0x4b   :  { %626 = vmatprep.subr.mxu1 %v180_v25  ;;  %589 = vmatpush3.msra.mxu0 %v132_v26  ;;  %v55_v12 = vld [vmem:[#allocation2 + $0x68] sm:$0xff]  ;;  %v57_v13 = vld [vmem:[#allocation2 + $0x78] sm:$0xff]  ;;  %v54_v14 = vld [vmem:[#allocation2 + $0x60] sm:$0xff] }
  0x4c   :  { %627 = vmatpush3.msra.mxu1 %v164_v27  ;;  %590 = vmatprep.subr.mxu0 %v147_v28  ;;  %v56_v15 = vld [vmem:[#allocation2 + $0x70] sm:$0xff]  ;;  %v501_v23 = vld [vmem:[%s747_s2] ss:$0 sm:$0xff] }
  0x4d   :  { %628 = vmatprep.subr.mxu1 %v179_v29  ;;  %591 = vmatpush3.msra.mxu0 %v131_v30 }
  0x4e   :  { %629 = vmatpush3.msra.mxu1 %v163_v31  ;;  %592 = vmatprep.subr.mxu0 %v146_v32 }
  0x4f   :  { %630 = vmatprep.subr.mxu1 %v178_v33  ;;  %593 = vmatpush3.msra.mxu0 %v130_v34 }
  0x50   :  { %631 = vmatpush3.msra.mxu1 %v162_v35  ;;  %594 = vmatprep.subr.mxu0 %v145_v36 }
  0x51   :  { %632 = vmatprep.subr.mxu1 %v177_v37  ;;  %595 = vmatpush3.msra.mxu0 %v129_v38 }
  0x52   :  { %633 = vmatpush3.msra.mxu1 %v161_v39  ;;  %596 = vmatprep.subr.mxu0 %v144_v40 }
  0x53   :  { %634 = vmatprep.subr.mxu1 %v176_v41  ;;  %597 = vmatpush3.msra.mxu0 %v128_v42 }
  0x54   :  { %635 = vmatpush3.msra.mxu1 %v160_v43  ;;  %598 = vmatprep.subr.mxu0 %v143_v44 }
  0x55   :  { %636 = vmatprep.subr.mxu1 %v175_v45  ;;  %599 = vmatpush3.msra.mxu0 %v127_v46 }
  0x56   :  { %637 = vmatpush3.msra.mxu1 %v159_v47  ;;  %600 = vmatprep.subr.mxu0 %v142_v48 }
  0x57   :  { %638 = vmatprep.subr.mxu1 %v174_v49  ;;  %601 = vmatpush3.msra.mxu0 %v126_v50 }
  0x58   :  { %639 = vmatpush3.msra.mxu1 %v158_v51  ;;  %602 = vmatprep.subr.mxu0 %v141_v52 }
  0x59   :  { %640 = vmatprep.subr.mxu1 %v173_v53  ;;  %262 = vmatprep.mubr.f32.mxu0 %v51_v54 }
  0x5a   :  { %603 = vmatpush3.msra.mxu0 %v125_v55  ;;  %641 = vmatpush3.msra.mxu1 %v157_v56 }
  0x5b   :  { %263 = vmatmul.mubr.f32.gmra.mxu0 %v50_v57  ;;  %604 = vmatprep.subr.mxu0 %v140_v58 }
  0x5c   :  { %642 = vmatprep.subr.mxu1 %v172_v59  ;;  %337 = vmatprep.mubr.f32.mxu1 %v53_v60 }
  0x5d   :  { %605 = vmatpush3.msra.mxu0 %v124_v61  ;;  %643 = vmatpush3.msra.mxu1 %v156_v62 }
  0x5e   :  { %606 = vmatprep.subr.mxu0 %v139_v63  ;;  %338 = vmatmul.mubr.f32.gmra.mxu1 %v52_v0 }
  0x5f   :  { %644 = vmatprep.subr.mxu1 %v171_v1  ;;  %607 = vmatpush3.msra.mxu0 %v123_v2 }
  0x60   :  { %645 = vmatpush3.msra.mxu1 %v155_v3  ;;  %608 = vmatprep.subr.mxu0 %v138_v4 }
  0x61   :  { %646 = vmatprep.subr.mxu1 %v170_v5  ;;  %609 = vmatpush3.msra.mxu0 %v122_v6 }
  0x62   :  { %407 = vmatprep.mubr.f32.mxu0 %v47_v7  ;;  %647 = vmatpush3.msra.mxu1 %v154_v8 }
  0x63   :  { %482 = vmatprep.mubr.f32.mxu1 %v49_v9  ;;  %408 = vmatmul.mubr.f32.vlgmr.msra.gmra.mxu0 %v46_v10 }
  0x64   :  { %483 = vmatmul.mubr.f32.vlgmr.msra.gmra.mxu1 %v48_v11  ;;  %412 = vmatprep.mubr.f32.mxu0 %v55_v12 }
  0x65   :  { %487 = vmatprep.mubr.f32.mxu1 %v57_v13 }
  0x67   :  { %413 = vmatmul.mubr.f32.gmra.mxu0 %v54_v14 }
  0x68   :  { %488 = vmatmul.mubr.f32.gmra.mxu1 %v56_v15 }
  0xff   :  { %v534_v16 = vpop.f32.mrf.mxu0 }
 0x101   :  { %v572_v17 = vpop.f32.mrf.mxu1  ;;  %v535_v18 = vpop.f32.mrf.mxu0 }
 0x102   :  { %v536_v21 = vadd.f32 %v535_v18, %v534_v16 }
 0x103   :  { %v573_v20 = vpop.f32.mrf.mxu1 }
 0x104   :  { %v260_v26 = vadd.f32 %v536_v21, %v501_v23  ;;  %v574_v27 = vadd.f32 %v573_v20, %v572_v17 }
 0x106   :  { %v335_v33 = vadd.f32 %v574_v27, %v260_v26 }
 0x11b   :  { %v537_v19 = vpop.f32.mrf.mxu0 }
 0x11d   :  { %v538_v24 = vpop.f32.mrf.mxu0 }
 0x11e   :  { %v575_v22 = vpop.f32.mrf.mxu1  ;;  %v539_v28 = vadd.f32 %v538_v24, %v537_v19 }
 0x120   :  { %v576_v25 = vpop.f32.mrf.mxu1  ;;  %v265_v34 = vadd.f32 %v539_v28, %v501_v23 }
 0x121   :  { %v577_v35 = vadd.f32 %v576_v25, %v575_v22 }
 0x123   :  { %v610_v29 = vpop.f32.mrf.mxu0  ;;  %v340_v43 = vadd.f32 %v577_v35, %v265_v34 }
 0x124   :  { %v648_v30 = vpop.f32.mrf.mxu1 }
 0x125   :  { %v611_v31 = vpop.f32.mrf.mxu0 }
 0x126   :  { %v649_v32 = vpop.f32.mrf.mxu1  ;;  %v612_v36 = vadd.f32 %v611_v31, %v610_v29 }
 0x127   :  { %v613_v37 = vpop.f32.mrf.mxu0  ;;  %v650_v40 = vadd.f32 %v649_v32, %v648_v30 }
 0x128   :  { %v651_v38 = vpop.f32.mrf.mxu1  ;;  %v410_v39 = vadd.f32 %v612_v36, %v335_v33 }
 0x129   :  { %v614_v41 = vpop.f32.mrf.mxu0 }
 0x12a   :  { %v652_v42 = vpop.f32.mrf.mxu1  ;;  %v485_v44 = vadd.f32 %v650_v40, %v410_v39  ;;  %v615_v45 = vadd.f32 %v614_v41, %v613_v37 }
 0x12b   :  { %v653_v47 = vadd.f32 %v652_v42, %v651_v38 }
 0x12c   :  { %493 = vst [vmem:[%s748_s3] sm:$0xff] %v485_v44  ;;  %v415_v46 = vadd.f32 %v615_v45, %v340_v43 }
 0x12e   :  { %v490_v48 = vadd.f32 %v653_v47, %v415_v46 }
 0x130   :  { %494 = vst [vmem:[%s748_s3 + $0x8] sm:$0xff] %v490_v48 }
 0x131   :  { %499 = vsyncpa [#allocation3], 1 }
 0x132   :  { %500 = vsyncpa [#allocation5], 1 }

</bundles_post_ra>
